<compile_context>
chip_gen: v7x
topology: tpu7x:2x2x1
jax: 0.10.0
libtpu: 0.0.40
codegen_flags: <defaults>
</compile_context>

<pallas_src>
import numpy as np
import jax
import jax.numpy as jnp
from jax.experimental import pallas as pl
from jax.experimental.pallas import tpu as pltpu

LEAK = 0.1                  # LeakyReLU negative slope of the edge_only model
NODE_F = 16
EDGE_F = 10
IN_F = 2 * NODE_F + EDGE_F  # 42
IN_PAD = 48                 # 42 rounded up to a sublane-aligned row count
DIMS = [IN_F, 64, 32, 16, 8, 2]   # 42 -> 64 -> 32 -> 16 -> 8 -> 2

MAX_EDGE_TILE = 2048        # edges per grid step (footprint is tiny now)
MIN_EDGE_BUCKET = 256       # smallest padded edge count


def _tensorcores_per_chip():
    # v7x (and v4 megacore) expose 2 TensorCores per chip; v5e/v6e have 1.
    # Splitting the grid only pays off when >1 TC shares it -- on a single-TC
    # chip the grid is a serial loop and splitting just adds per-step overhead.
    try:
        kind = jax.devices()[0].device_kind.lower()
        if "v7" in kind or "v4" in kind:
            return 2
    except Exception:
        pass
    return 1


_TC_PER_CHIP = _tensorcores_per_chip()

# ---------------------------------------------------------------------------
# Packed parameter layout
# ---------------------------------------------------------------------------
# Weights live in one (128, 64) bf16 slab: each (fan_out, fan_in) block is
# stacked along sublanes at an 8-aligned row offset, columns start at lane 0.
# W1's fan_in is padded 42 -> 48 with zero columns (matches the zero-padded
# rows of the input slab).  Biases live in one (128, 1) f32 slab.
_W_ROWS = ((0, 64, IN_PAD),     # W1 (64, 48)
           (64, 96, 64),        # W2 (32, 64)
           (96, 112, 32),       # W3 (16, 32)
           (112, 120, 16),      # W4 (8, 16)
           (120, 122, 8))       # W5 (2, 8)
_B_ROWS = ((0, 64), (64, 96), (96, 112), (112, 120), (120, 122))
_W_SLAB_SHAPE = (128, 64)
_B_SLAB_SHAPE = (128, 1)


def _pack_params(layers):
    """layers: list of (W (fan_out, fan_in), b (fan_out,)) float32 numpy arrays."""
    w_slab = np.zeros(_W_SLAB_SHAPE, np.float32)
    b_slab = np.zeros(_B_SLAB_SHAPE, np.float32)
    for (r0, r1, _), (br0, br1), (w, b) in zip(_W_ROWS, _B_ROWS, layers):
        w_slab[r0:r1, :w.shape[1]] = w
        b_slab[br0:br1, 0] = b
    return jnp.asarray(w_slab, jnp.bfloat16), jnp.asarray(b_slab, jnp.float32)


# ---------------------------------------------------------------------------
# Pallas kernel: streaming 5-layer edge MLP (transposed, lane-dense)
# ---------------------------------------------------------------------------
def _edge_mlp_kernel(h_ref, w_ref, b_ref, out_ref):
    # h_ref  : (48, T)   bf16  [x[row]; x[col]; e; 0-pad] feature slab (transposed)
    # w_ref  : (128, 64) bf16  packed weights
    # b_ref  : (128, 1)  f32   packed biases
    # out_ref: (2, T)    f32   logits (lane-dense)
    def lrelu(v):
        return jnp.maximum(v, LEAK * v)      # LeakyReLU, one op/elem

    def w(i):
        r0, r1, cols = _W_ROWS[i]
        return w_ref[r0:r1, 0:cols]

    def b(i):
        r0, r1 = _B_ROWS[i]
        return b_ref[r0:r1, :]

    # Layer 1 directly on the streamed slab (gather happened outside the kernel).
    h = lrelu(jnp.dot(w(0), h_ref[...], preferred_element_type=jnp.float32) + b(0))
    # Layers 2..4
    for li in (1, 2, 3):
        h = lrelu(jnp.dot(w(li), h.astype(jnp.bfloat16),
                          preferred_element_type=jnp.float32) + b(li))
    # Layer 5 (logits), lane-dense (2, T) store.
    out_ref[...] = (jnp.dot(w(4), h.astype(jnp.bfloat16),
                            preferred_element_type=jnp.float32) + b(4))


def _edge_mlp_pallas(hT, w_slab, b_slab):
    """hT (48, e_pad) bf16 -> logits (2, e_pad) f32."""
    e_pad = hT.shape[1]
    if _TC_PER_CHIP > 1 and e_pad >= 2 * 128:
        # Keep >= 2 parallel steps so both TensorCores get work (v7x megacore).
        tile = min(MAX_EDGE_TILE, e_pad // 2)
    else:
        # Single TC: one big tile; the grid is a serial loop, splitting only
        # adds ~0.35 us/step of pipeline overhead.
        tile = min(MAX_EDGE_TILE, e_pad)
    grid = (e_pad // tile,)   # e_pad and tile are both powers of two

    def full(shape):
        return pl.BlockSpec(shape, lambda i: (0, 0))

    def edge_blk(rows):
        return pl.BlockSpec((rows, tile), lambda i: (0, i))

    return pl.pallas_call(
        _edge_mlp_kernel,
        out_shape=jax.ShapeDtypeStruct((2, e_pad), jnp.float32),
        grid=grid,
        in_specs=[edge_blk(IN_PAD),           # streamed edge feature slab
                  full(_W_SLAB_SHAPE),        # packed weights (resident)
                  full(_B_SLAB_SHAPE)],       # packed biases (resident)
        out_specs=edge_blk(2),
        compiler_params=pltpu.CompilerParams(dimension_semantics=("parallel",)),
    )(hT, w_slab, b_slab)


# ---------------------------------------------------------------------------
# BatchNorm (training mode, masked so padded rows don't pollute statistics)
# ---------------------------------------------------------------------------
def _masked_batch_norm(x, n_valid, gamma, beta, eps=1e-5):
    mask = (jnp.arange(x.shape[0], dtype=jnp.int32) < n_valid)[:, None].astype(x.dtype)
    cnt = n_valid.astype(x.dtype)
    mu = jnp.sum(x * mask, axis=0, keepdims=True) / cnt
    var = jnp.sum(jnp.square(x - mu) * mask, axis=0, keepdims=True) / cnt
    return (x - mu) * jax.lax.rsqrt(var + eps) * gamma + beta


@jax.jit
def _edge_predictor_jit(x_p, e_p, row, col, n_valid, e_valid,
                        bn_ng, bn_nb, bn_eg, bn_eb, w_slab, b_slab):
    xb = _masked_batch_norm(x_p, n_valid, bn_ng, bn_nb)           # (n_pad, 16) f32
    eb = _masked_batch_norm(e_p, e_valid, bn_eg, bn_eb)           # (e_pad, 10) f32
    xbT = xb.T.astype(jnp.bfloat16)                               # (16, n_pad)
    ebT = eb.T.astype(jnp.bfloat16)                               # (10, e_pad)
    # Endpoint gather as a plain XLA gather (out-of-kernel; see perf review).
    xrT = jnp.take(xbT, row, axis=1)                              # (16, e_pad)
    xcT = jnp.take(xbT, col, axis=1)                              # (16, e_pad)
    zpad = jnp.zeros((IN_PAD - IN_F, row.shape[0]), jnp.bfloat16)
    hT = jnp.concatenate([xrT, xcT, ebT, zpad], axis=0)           # (48, e_pad)
    return _edge_mlp_pallas(hT, w_slab, b_slab)                   # (2, e_pad) f32


# ---------------------------------------------------------------------------
# edge_only edge predictor
# ---------------------------------------------------------------------------
class EdgeOnlyPredictor:
    """JAX/Pallas equivalent of mlreco's 'edge_only' EdgeModel."""

    def __init__(self, cfg, key):
        del cfg
        layers = []
        for fi, fo in zip(DIMS[:-1], DIMS[1:]):
            key, k1, k2 = jax.random.split(key, 3)
            bound = 1.0 / np.sqrt(fi)
            w = np.asarray(jax.random.uniform(k1, (fo, fi), jnp.float32, -bound, bound))
            b = np.asarray(jax.random.uniform(k2, (fo,), jnp.float32, -bound, bound))
            layers.append((w, b))
        self.layers = layers                                # PyTorch-layout copies
        self.w_slab, self.b_slab = _pack_params(layers)     # packed kernel params
        # BatchNorm1d affine params (PyTorch default init: weight=1, bias=0)
        # TODO(synk): training-mode batch statistics only (no running mean/var
        # eval semantics), matching the reference's default train() usage.
        self.bn_node_g = jnp.ones((1, NODE_F), jnp.float32)
        self.bn_node_b = jnp.zeros((1, NODE_F), jnp.float32)
        self.bn_edge_g = jnp.ones((1, EDGE_F), jnp.float32)
        self.bn_edge_b = jnp.zeros((1, EDGE_F), jnp.float32)

    def __call__(self, x, edge_index, e, xbatch):
        del xbatch  # unused by the edge_only model
        x = np.asarray(x, np.float32)
        e = np.asarray(e, np.float32)
        edge_index = np.asarray(edge_index)
        N, E = x.shape[0], e.shape[0]

        # Power-of-two bucketing (host-side numpy padding) -> jit cache reuse.
        n_pad = max(128, -(-N // 128) * 128)
        e_pad = max(MIN_EDGE_BUCKET, 1 << int(max(E - 1, 1)).bit_length())
        x_p = np.zeros((n_pad, NODE_F), np.float32); x_p[:N] = x
        e_p = np.zeros((e_pad, EDGE_F), np.float32); e_p[:E] = e
        row = np.zeros((e_pad,), np.int32); row[:E] = edge_index[0]
        col = np.zeros((e_pad,), np.int32); col[:E] = edge_index[1]

        outT_pad = _edge_predictor_jit(
            jnp.asarray(x_p), jnp.asarray(e_p), jnp.asarray(row), jnp.asarray(col),
            jnp.asarray(N, jnp.int32), jnp.asarray(E, jnp.int32),
            self.bn_node_g, self.bn_node_b, self.bn_edge_g, self.bn_edge_b,
            self.w_slab, self.b_slab)                        # (2, e_pad) f32
        # Padded edges (row/col=0, zero features) still produce logits; the
        # host-side [:E] slice drops them.  Every device program stays
        # shape-stable (no per-E recompiles); the transpose is a tiny numpy op.
        out = jnp.asarray(np.asarray(outT_pad)[:, :E].T)     # (E, 2)
        return [[out]]


def _reference_edge_predictor(pred, x, edge_index, e):
    """Plain-JAX reference mirroring the kernel's bf16/f32 casts (for checking)."""
    x = jnp.asarray(x, jnp.float32)
    e = jnp.asarray(e, jnp.float32)
    xb = _masked_batch_norm(x, jnp.asarray(x.shape[0], jnp.int32),
                            pred.bn_node_g, pred.bn_node_b)
    eb = _masked_batch_norm(e, jnp.asarray(e.shape[0], jnp.int32),
                            pred.bn_edge_g, pred.bn_edge_b)
    row = jnp.asarray(edge_index[0], jnp.int32)
    col = jnp.asarray(edge_index[1], jnp.int32)
    h = jnp.concatenate([xb[row], xb[col], eb], axis=1).astype(jnp.bfloat16)
    for li, (w, b) in enumerate(pred.layers):
        h = jnp.dot(h, jnp.asarray(w, jnp.bfloat16).T,
                    preferred_element_type=jnp.float32) + jnp.asarray(b, jnp.float32)[None, :]
        if li < len(pred.layers) - 1:
            h = jnp.maximum(h, LEAK * h).astype(jnp.bfloat16)
    return h


# ---------------------------------------------------------------------------
# Graph / cluster helper functions (host-side glue, simplified numpy versions)
# ---------------------------------------------------------------------------
# TODO(synk): the real form_clusters_new / assign_primaries / feature extractors
# use DBSCAN output conventions; simplified deterministic equivalents are used
# here since they are host-side glue, not kernel work.
def form_clusters_new(data):
    # data columns: [x, y, z, batch, value, cluster_id]
    cids = np.unique(data[:, 5])
    return [np.where(data[:, 5] == c)[0] for c in cids]


def filter_compton(clusts, compton_thresh=30):
    return np.where(np.array([len(c) for c in clusts]) > compton_thresh)[0]


def get_cluster_batch(data, clusts):
    return np.array([int(data[c[0], 3]) for c in clusts], dtype=np.int64)


def assign_primaries(primaries, clusts, data, max_dist=None):
    out = []
    for p in np.asarray(primaries):
        pb = int(p[3])
        best, bestd = -1, np.inf
        for ci, c in enumerate(clusts):
            if int(data[c[0], 3]) != pb:
                continue
            d = np.min(np.linalg.norm(data[c, :3] - p[:3], axis=1))
            if d < bestd:
                bestd, best = d, ci
        if best >= 0 and (max_dist is None or bestd < max_dist):
            out.append(best)
    return np.unique(np.array(out, dtype=np.int64))


def cluster_vtx_features(data, clusts):
    # 16 features per cluster: center(3) + normalized covariance(9) +
    # principal axis(3) + size(1)
    feats = []
    for c in clusts:
        pts = data[c, :3]
        center = pts.mean(axis=0)
        x = pts - center
        A = x.T @ x / len(c)
        B = A / (np.trace(A) + 1e-8)
        w, v = np.linalg.eigh(A)
        v0 = v[:, -1]
        feats.append(np.concatenate([center, B.flatten(), v0, [float(len(c))]]))
    return np.stack(feats).astype(np.float32)


def cluster_edge_features(data, clusts, edge_index):
    # 10 features per edge: outer-product of unit displacement between closest
    # points of the two clusters (9) + separation length (1)
    feats = []
    for k in range(edge_index.shape[1]):
        i, j = int(edge_index[0, k]), int(edge_index[1, k])
        x1, x2 = data[clusts[i], :3], data[clusts[j], :3]
        d = np.linalg.norm(x1[:, None, :] - x2[None, :, :], axis=-1)
        a, b = np.unravel_index(np.argmin(d), d.shape)
        disp = x1[a] - x2[b]
        lend = np.linalg.norm(disp)
        if lend > 0:
            disp = disp / lend
        B = np.outer(disp, disp).flatten()
        feats.append(np.concatenate([B, [lend]]))
    return np.stack(feats).astype(np.float32)


def primary_bipartite_incidence(batch, assigned):
    assigned = set(int(a) for a in assigned)
    others = [i for i in range(len(batch)) if i not in assigned]
    edges = [[i, j] for i in sorted(assigned) for j in others if batch[i] == batch[j]]
    if len(edges) == 0:
        return np.zeros((2, 0), dtype=np.int64)
    return np.array(edges, dtype=np.int64).T


# ---------------------------------------------------------------------------
# IterativeEdgeModel
# ---------------------------------------------------------------------------
class IterativeEdgeModel:
    def __init__(self, cfg, key):
        if 'modules' in cfg:
            self.model_config = cfg['modules']['iter_edge_model']
        else:
            self.model_config = cfg
        self.remove_compton = self.model_config.get('remove_compton', True)
        self.compton_thresh = self.model_config.get('compton_thresh', 30)
        self.edge_predictor = EdgeOnlyPredictor(self.model_config.get('model_cfg', {}), key)
        self.maxiter = self.model_config.get('maxiter', np.inf)
        self.thresh = self.model_config.get('thresh', 0.9)
        self.pmd = self.model_config.get('primary_max_dist', None)

    @staticmethod
    def assign_clusters(edge_index, edge_pred, others, matched, thresh=0.5):
        found_match = False
        edge_pred = np.asarray(edge_pred)
        for i in others:
            inds = edge_index[1, :] == i
            if int(inds.sum()) == 0:
                continue
            indmax = int(np.argmax(edge_pred[inds]))
            ei = np.where(inds)[0][indmax]
            if edge_pred[ei] > thresh:
                found_match = True
                j = int(edge_index[0, ei])
                matched[i] = matched[j]
        return matched, found_match

    def forward(self, data):
        clusts = form_clusters_new(data[0])
        if self.remove_compton:
            selection = filter_compton(clusts, self.compton_thresh)
            if not len(selection):
                return jnp.array([], jnp.float32)
            clusts = [clusts[i] for i in selection]
        batch = get_cluster_batch(data[0], clusts)
        xbatch = jnp.asarray(batch, jnp.int32)
        primaries = assign_primaries(data[1], clusts, data[0], max_dist=self.pmd)
        matched = np.repeat(-1, len(clusts))
        matched[primaries] = primaries

        # Node geometric features do not change across the iterative loop:
        # compute them once (identical result to recomputing each iteration).
        x = cluster_vtx_features(data[0], clusts)

        edges, edge_pred = [], []
        counter = 0
        found_match = True
        while (matched == -1).any() and counter < self.maxiter and found_match:
            counter += 1
            assigned = np.where(matched > -1)[0]
            others = np.where(matched == -1)[0]
            edge_index = primary_bipartite_incidence(batch, assigned)
            if edge_index.shape[1] < 2:
                counter -= 1
                break
            e = cluster_edge_features(data[0], clusts, edge_index)
            out = self.edge_predictor(x, edge_index, e, xbatch)     # Pallas MLP
            edge_pred.append(out[0][0])
            edges.append(edge_index)
            # NB: matches the reference module -- thresholds the raw logit diff.
            matched, found_match = self.assign_clusters(
                edge_index, out[0][0][:, 1] - out[0][0][:, 0], others, matched, self.thresh)

        return {'edges': [edges],
                'edge_pred': [edge_pred],
                'matched': [jnp.asarray(matched)],
                'counter': [jnp.asarray([counter])]}


# ---------------------------------------------------------------------------
# Synthetic deterministic example
# ---------------------------------------------------------------------------
def _make_synthetic_data(key):
    # 7 clusters (4 in batch 0, 3 in batch 1), 8 voxels each
    batch_of_cluster = [0, 0, 0, 0, 1, 1, 1]
    centers = np.array([[0., 0., 0.], [10., 0., 0.], [0., 10., 0.], [10., 10., 0.],
                        [0., 0., 20.], [10., 0., 20.], [0., 10., 20.]])
    pts_per_cluster = 8
    rows = []
    for cid, (b, c) in enumerate(zip(batch_of_cluster, centers)):
        key, sub = jax.random.split(key)
        offs = np.asarray(jax.random.normal(sub, (pts_per_cluster, 3))) * 0.5
        pos = c[None, :] + offs
        for p in pos:
            rows.append([p[0], p[1], p[2], float(b), 1.0, float(cid)])
    data0 = np.array(rows, dtype=np.float64)
    # two primary points: near cluster 0 (batch 0) and cluster 4 (batch 1)
    data1 = np.array([[0.1, 0.1, 0.1, 0.0, 0.0],
                      [0.1, 0.1, 20.1, 1.0, 1.0]], dtype=np.float64)
    return data0, data1


if __name__ == "__main__":
    key = jax.random.PRNGKey(0)
    key, data_key, model_key, chk_key = jax.random.split(key, 4)

    data0, data1 = _make_synthetic_data(data_key)
    cfg = {
        'remove_compton': True,
        'compton_thresh': 4,      # keep clusters with > 4 voxels
        'name': 'edge_only',
        'model_cfg': {'leak': LEAK},
        'maxiter': 5,
        'thresh': 0.0,            # low threshold so the iterative loop actually iterates
        'primary_max_dist': None,
    }

    model = IterativeEdgeModel(cfg, model_key)

    # One-shot numerical check of the Pallas path vs. a plain-JAX reference
    # that mirrors the kernel's bf16/f32 casting.
    kx, ke = jax.random.split(chk_key)
    x_chk = np.asarray(jax.random.normal(kx, (7, NODE_F), jnp.float32))
    e_chk = np.asarray(jax.random.normal(ke, (5, EDGE_F), jnp.float32))
    ei_chk = np.array([[0, 0, 0, 4, 4], [1, 2, 3, 5, 6]], dtype=np.int64)
    got = model.edge_predictor(x_chk, ei_chk, e_chk, None)[0][0]
    want = _reference_edge_predictor(model.edge_predictor, x_chk, ei_chk, e_chk)
    np.testing.assert_allclose(np.asarray(got), np.asarray(want), atol=2e-2, rtol=2e-2)

    out = model.forward([data0, data1])

    for ep in out['edge_pred'][0]:
        jax.block_until_ready(ep)
    jax.block_until_ready(out['matched'][0])
    jax.block_until_ready(out['counter'][0])
    print("KERNEL_OK")
</pallas_src>

<mosaic_0001>
module attributes {stable_mosaic.version = 11 : i64} {
  func.func @_edge_mlp_kernel(%arg0: i32, %arg1: memref<48x256xbf16, #tpu.memory_space<vmem>>, %arg2: memref<128x64xbf16, #tpu.memory_space<vmem>>, %arg3: memref<128x1xf32, #tpu.memory_space<vmem>>, %arg4: memref<2x256xf32, #tpu.memory_space<vmem>>) attributes {dimension_semantics = [#tpu.dimension_semantics<parallel>], iteration_bounds = array<i64: 1>, scalar_prefetch = 0 : i64, scratch_operands = 0 : i64, tpu.core_type = #tpu.core_type<tc>, window_params = [{transform_indices = @transform_0, window_bounds = array<i64: 48, 256>}, {pipeline_mode = #tpu.pipeline_mode<synchronous>, transform_indices = @transform_1, window_bounds = array<i64: 128, 64>}, {pipeline_mode = #tpu.pipeline_mode<synchronous>, transform_indices = @transform_2, window_bounds = array<i64: 128, 1>}, {transform_indices = @transform_3, window_bounds = array<i64: 2, 256>}]} {
    %c0 = arith.constant 0 : index
    %c0_0 = arith.constant 0 : index
    %0 = vector.load %arg2[%c0, %c0_0] : memref<128x64xbf16, #tpu.memory_space<vmem>>, vector<64x48xbf16>
    %c0_1 = arith.constant 0 : index
    %c0_2 = arith.constant 0 : index
    %1 = vector.load %arg1[%c0_1, %c0_2] : memref<48x256xbf16, #tpu.memory_space<vmem>>, vector<48x256xbf16>
    %cst = arith.constant dense<0.000000e+00> : vector<64x256xf32>
    %2 = tpu.matmul %0, %1, %cst {dimension_numbers = #tpu.dot_dimension_numbers<[1], [0], [0], [1], [0, 0, 1, 1], [], []>} : vector<64x48xbf16>, vector<48x256xbf16>, vector<64x256xf32> -> vector<64x256xf32>
    %c0_3 = arith.constant 0 : index
    %c0_4 = arith.constant 0 : index
    %3 = vector.load %arg3[%c0_3, %c0_4] : memref<128x1xf32, #tpu.memory_space<vmem>>, vector<64x1xf32>
    %4 = vector.broadcast %3 : vector<64x1xf32> to vector<64x256xf32>
    %5 = arith.addf %2, %4 : vector<64x256xf32>
    %cst_5 = arith.constant 1.000000e-01 : f32
    %6 = vector.broadcast %cst_5 : f32 to vector<64x256xf32>
    %7 = arith.mulf %6, %5 : vector<64x256xf32>
    %8 = arith.maximumf %5, %7 : vector<64x256xf32>
    %c64 = arith.constant 64 : index
    %c0_6 = arith.constant 0 : index
    %9 = vector.load %arg2[%c64, %c0_6] : memref<128x64xbf16, #tpu.memory_space<vmem>>, vector<32x64xbf16>
    %10 = arith.truncf %8 : vector<64x256xf32> to vector<64x256xbf16>
    %cst_7 = arith.constant dense<0.000000e+00> : vector<32x256xf32>
    %11 = tpu.matmul %9, %10, %cst_7 {dimension_numbers = #tpu.dot_dimension_numbers<[1], [0], [0], [1], [0, 0, 1, 1], [], []>} : vector<32x64xbf16>, vector<64x256xbf16>, vector<32x256xf32> -> vector<32x256xf32>
    %c64_8 = arith.constant 64 : index
    %c0_9 = arith.constant 0 : index
    %12 = vector.load %arg3[%c64_8, %c0_9] : memref<128x1xf32, #tpu.memory_space<vmem>>, vector<32x1xf32>
    %13 = vector.broadcast %12 : vector<32x1xf32> to vector<32x256xf32>
    %14 = arith.addf %11, %13 : vector<32x256xf32>
    %cst_10 = arith.constant 1.000000e-01 : f32
    %15 = vector.broadcast %cst_10 : f32 to vector<32x256xf32>
    %16 = arith.mulf %15, %14 : vector<32x256xf32>
    %17 = arith.maximumf %14, %16 : vector<32x256xf32>
    %c96 = arith.constant 96 : index
    %c0_11 = arith.constant 0 : index
    %18 = vector.load %arg2[%c96, %c0_11] : memref<128x64xbf16, #tpu.memory_space<vmem>>, vector<16x32xbf16>
    %19 = arith.truncf %17 : vector<32x256xf32> to vector<32x256xbf16>
    %cst_12 = arith.constant dense<0.000000e+00> : vector<16x256xf32>
    %20 = tpu.matmul %18, %19, %cst_12 {dimension_numbers = #tpu.dot_dimension_numbers<[1], [0], [0], [1], [0, 0, 1, 1], [], []>} : vector<16x32xbf16>, vector<32x256xbf16>, vector<16x256xf32> -> vector<16x256xf32>
    %c96_13 = arith.constant 96 : index
    %c0_14 = arith.constant 0 : index
    %21 = vector.load %arg3[%c96_13, %c0_14] : memref<128x1xf32, #tpu.memory_space<vmem>>, vector<16x1xf32>
    %22 = vector.broadcast %21 : vector<16x1xf32> to vector<16x256xf32>
    %23 = arith.addf %20, %22 : vector<16x256xf32>
    %cst_15 = arith.constant 1.000000e-01 : f32
    %24 = vector.broadcast %cst_15 : f32 to vector<16x256xf32>
    %25 = arith.mulf %24, %23 : vector<16x256xf32>
    %26 = arith.maximumf %23, %25 : vector<16x256xf32>
    %c112 = arith.constant 112 : index
    %c0_16 = arith.constant 0 : index
    %27 = vector.load %arg2[%c112, %c0_16] : memref<128x64xbf16, #tpu.memory_space<vmem>>, vector<8x16xbf16>
    %28 = arith.truncf %26 : vector<16x256xf32> to vector<16x256xbf16>
    %cst_17 = arith.constant dense<0.000000e+00> : vector<8x256xf32>
    %29 = tpu.matmul %27, %28, %cst_17 {dimension_numbers = #tpu.dot_dimension_numbers<[1], [0], [0], [1], [0, 0, 1, 1], [], []>} : vector<8x16xbf16>, vector<16x256xbf16>, vector<8x256xf32> -> vector<8x256xf32>
    %c112_18 = arith.constant 112 : index
    %c0_19 = arith.constant 0 : index
    %30 = vector.load %arg3[%c112_18, %c0_19] : memref<128x1xf32, #tpu.memory_space<vmem>>, vector<8x1xf32>
    %31 = vector.broadcast %30 : vector<8x1xf32> to vector<8x256xf32>
    %32 = arith.addf %29, %31 : vector<8x256xf32>
    %cst_20 = arith.constant 1.000000e-01 : f32
    %33 = vector.broadcast %cst_20 : f32 to vector<8x256xf32>
    %34 = arith.mulf %33, %32 : vector<8x256xf32>
    %35 = arith.maximumf %32, %34 : vector<8x256xf32>
    %c120 = arith.constant 120 : index
    %c0_21 = arith.constant 0 : index
    %36 = vector.load %arg2[%c120, %c0_21] : memref<128x64xbf16, #tpu.memory_space<vmem>>, vector<2x8xbf16>
    %37 = arith.truncf %35 : vector<8x256xf32> to vector<8x256xbf16>
    %cst_22 = arith.constant dense<0.000000e+00> : vector<2x256xf32>
    %38 = tpu.matmul %36, %37, %cst_22 {dimension_numbers = #tpu.dot_dimension_numbers<[1], [0], [0], [1], [0, 0, 1, 1], [], []>} : vector<2x8xbf16>, vector<8x256xbf16>, vector<2x256xf32> -> vector<2x256xf32>
    %c120_23 = arith.constant 120 : index
    %c0_24 = arith.constant 0 : index
    %39 = vector.load %arg3[%c120_23, %c0_24] : memref<128x1xf32, #tpu.memory_space<vmem>>, vector<2x1xf32>
    %40 = vector.broadcast %39 : vector<2x1xf32> to vector<2x256xf32>
    %41 = arith.addf %38, %40 : vector<2x256xf32>
    %c0_25 = arith.constant 0 : index
    %c0_26 = arith.constant 0 : index
    %42 = vector.load %arg4[%c0_25, %c0_26] : memref<2x256xf32, #tpu.memory_space<vmem>>, vector<2x256xf32>
    tpu.vector_store %arg4[%c0_25, %c0_26], %41 {strides = array<i32>} : memref<2x256xf32, #tpu.memory_space<vmem>>, vector<2x256xf32>,
    return
  }
  func.func @transform_0(%arg0: i32) -> (i32, i32) {
    %c0_i32 = arith.constant 0 : i32
    %c0_i32_0 = arith.constant 0 : i32
    return %c0_i32, %arg0 : i32, i32
  }
  func.func @transform_1(%arg0: i32) -> (i32, i32) {
    %c0_i32 = arith.constant 0 : i32
    %c0_i32_0 = arith.constant 0 : i32
    %c0_i32_1 = arith.constant 0 : i32
    return %c0_i32, %c0_i32_0 : i32, i32
  }
  func.func @transform_2(%arg0: i32) -> (i32, i32) {
    %c0_i32 = arith.constant 0 : i32
    %c0_i32_0 = arith.constant 0 : i32
    %c0_i32_1 = arith.constant 0 : i32
    return %c0_i32, %c0_i32_0 : i32, i32
  }
  func.func @transform_3(%arg0: i32) -> (i32, i32) {
    %c0_i32 = arith.constant 0 : i32
    %c0_i32_0 = arith.constant 0 : i32
    return %c0_i32, %arg0 : i32, i32
  }
}

</mosaic_0001>

<bundles_post_ra>
// kernel: _edge_predictor_jit.1
= control target key start
LH: loop header
LB: loop body
LE: loop exit
PB: predicated region body
PF: predicated region fallthrough
CT: control target
= control target key end

     0   :  { %v659_v2 = vmov 0   ;;  %vm128_vm0 = vcmask 392192   ;;  %s801_s0 = inlined_call_operand.vmem [shape: bf16[48,256], index: 0, kind: input, shape index: {}]   ;;  %s802_s1 = inlined_call_operand.vmem [shape: bf16[128,64], index: 1, kind: input, shape index: {}]   ;;  %s803_s2 = inlined_call_operand.vmem [shape: f32[128,1], index: 2, kind: input, shape index: {}]   ;;  %s804_s3 = inlined_call_operand.hbm [shape: f32[2,256], index: 3, kind: output, shape index: {}]  }
   0x1   :  { %v619_v0 = vld [vmem:[%s801_s0 + $0x4] ss:$8 sps:$4 sm:$0xff]   ;;  %v621_v1 = vld [vmem:[%s801_s0] ss:$8 sps:$4 sm:$0xff]   ;;  %173 = vmatprep.mubr.bf16.mxu0 %v659_v2  ;;  %617 = vset.pattern.permute.xlu0 %v659_v2  ;;  %v622_v3 = vld [vmem:[%s801_s0 + $0x14] ss:$8 sps:$4 sm:$0xff]  }
   0x2   :  { %141 = vmatprep.subr.bf16.mxu0 %v619_v0  ;;  %618 = vset.pattern.permute.xlu1 %v659_v2  ;;  %v624_v4 = vld [vmem:[%s801_s0 + $0x10] ss:$8 sps:$4 sm:$0xff]   ;;  %v625_v5 = vld [vmem:[%s801_s0 + $0x24] ss:$8 sps:$4 sm:$0xff]   ;;  %v627_v6 = vld [vmem:[%s801_s0 + $0x20] ss:$8 sps:$4 sm:$0xff]  }
   0x3   :  { %142 = vmatpush1.bf16.msra.mxu0 %v621_v1  ;;  %331 = vmatprep.mubr.bf16.mxu1 %v659_v2  ;;  %v30_v7 = vld [vmem:[%s803_s2] sm:$0xff]  ;;  %v32_v8 = vld [vmem:[%s803_s2 + $0x10] sm:$0xff]  ;;  %v31_v10 = vld [vmem:[%s803_s2 + $0x8] sm:$0xff] }
   0x4   :  { %143 = vmatprep.subr.bf16.mxu0 %v622_v3  ;;  %40 = vperm.xlu0 %617, %v30_v7   ;;  %v628_v9 = vld [vmem:[%s802_s1] sm:$0xff]   ;;  %v33_v11 = vld [vmem:[%s803_s2 + $0x18] sm:$0xff]  ;;  %v35_v13 = vld [vmem:[%s803_s2 + $0x28] sm:$0xff] }
   0x5   :  { %50 = vperm.xlu1 %618, %v32_v8   ;;  %v34_v12 = vld [vmem:[%s803_s2 + $0x20] sm:$0xff] }
   0x7   :  { %144 = vmatpush1.bf16.msra.mxu0 %v624_v4 }
   0x8   :  { %145 = vmatprep.subr.bf16.mxu0 %v625_v5  ;;  %45 = vperm.xlu0 %617, %v31_v10  }
   0x9   :  { %55 = vperm.xlu1 %618, %v33_v11  }
   0xb   :  { %146 = vmatpush1.bf16.msra.mxu0 %v627_v6 }
   0xe   :  { %601 = vmatmul.mubr.msk.bf16.vlgmr.msra.gmra.mrb[0].mxu0 %vm128_vm0, %v628_v9 }
   0xf   :  { %183 = vmatprep.mubr.bf16.mxu0 %v659_v2 }
  0x10   :  { %8 = vsyncpa [#allocation3], 0  ;;  %60 = vperm.xlu0 %617, %v34_v12   ;;  %65 = vperm.xlu1 %618, %v35_v13   ;;  %v629_v14 = vld [vmem:[%s802_s1 + $0x8] sm:$0xff]   ;;  %v36_v15 = vld [vmem:[%s803_s2 + $0x30] sm:$0xff]  ;;  %vm292_vm1 = vcmask 523264   ;;  %vm391_vm2 = vcmask 261120  }
  0x11   :  { %v37_v16 = vld [vmem:[%s803_s2 + $0x38] sm:$0xff]  ;;  %v258_v17 = vld [vmem:[%s803_s2 + $0x40] sm:$0xff]  ;;  %v259_v18 = vld [vmem:[%s803_s2 + $0x48] sm:$0xff]  ;;  %vm455_vm3 = vcmask 130048   ;;  %vm517_vm4 = vcmask 1043456   ;;  %vm513_vm5 = vcmask 64512  }
  0x12   :  { %v630_v19 = vld [vmem:[%s802_s1 + $0x10] sm:$0xff]   ;;  %v261_v21 = vld [vmem:[%s803_s2 + $0x58] sm:$0xff]  ;;  %v374_v22 = vld [vmem:[%s803_s2 + $0x60] sm:$0xff]  ;;  %s660_s17 = smov [#allocation2]  }
  0x13   :  { %v260_v20 = vld [vmem:[%s803_s2 + $0x50] sm:$0xff]  ;;  %v375_v23 = vld [vmem:[%s803_s2 + $0x68] sm:$0xff]  ;;  %v631_v24 = vld [vmem:[%s802_s1 + $0x18] sm:$0xff]   ;;  %s583_s18 = sshll.u32 %s660_s17, 4  ;;  %s584_s18 = int_to_ptr.vmem [resolvable:$true] %s583_s18 }
  0x14   :  { %70 = vperm.xlu0 %617, %v36_v15   ;;  %75 = vperm.xlu1 %618, %v37_v16   ;;  %v449_v25 = vld [vmem:[%s803_s2 + $0x70] sm:$0xff]  ;;  %v507_v26 = vld [vmem:[%s803_s2 + $0x78] sm:$0x3]  ;;  %s635_s19 = scalar_lea.vmem %s584_s18, 64  ;;  %p640_p1 = scmp.lt.s32.totalorder %s584_s18, %s584_s18 }
  0x15   :  { %p636_p0 = scmp.ne.s32.totalorder %s584_s18, %s635_s19  ;;  %p641_p2 = scmp.lt.s32.totalorder %s635_s19, %s635_s19 }
  0x16   :  { %602 = vmatmul.mubr.msk.bf16.gmra.mrb[4].mxu0 %vm128_vm0, %v629_v14 }
  0x17   :  { %193 = vmatprep.mubr.bf16.mxu0 %v659_v2  ;;  %p642_p3 = por %p641_p2, %p640_p1 }
  0x18   :  { %264 = vperm.xlu0 %617, %v258_v17   ;;  %269 = vperm.xlu1 %618, %v259_v18  }
  0x19   :  { %p643_p4 = pnand %p642_p3, %p636_p0 }
  0x1c   :  { %274 = vperm.xlu0 %617, %v260_v20   ;;  %279 = vperm.xlu1 %618, %v261_v21  }
  0x1e   :  { %603 = vmatmul.mubr.msk.bf16.gmra.mrb[8].mxu0 %vm128_vm0, %v630_v19 }
  0x1f   :  { %203 = vmatprep.mubr.bf16.mxu0 %v659_v2 }
  0x20   :  { %378 = vperm.xlu0 %617, %v374_v22   ;;  %383 = vperm.xlu1 %618, %v375_v23  }
  0x24   :  { %452 = vperm.xlu0 %617, %v449_v25   ;;  %510 = vperm.xlu1 %618, %v507_v26  }
  0x26   :  { %604 = vmatmul.mubr.msk.bf16.gmra.mrb[12].mxu0 %vm128_vm0, %v631_v24 }
  0x27   :  { %556 = vmatprep.mubr.bf16.mxu0 %v659_v2 }
  0x83   :  { %v41_v27 = vpop.permute.xlu0 %40 }
  0x84   :  { %v51_v37 = vpop.permute.xlu1 %50 }
  0x87   :  { %v46_v31 = vpop.permute.xlu0 %45 }
  0x88   :  { %v56_v50 = vpop.permute.xlu1 %55 }
  0x8f   :  { %v61_v63 = vpop.permute.xlu0 %60  ;;  %v66_v7 = vpop.permute.xlu1 %65 }
  0x93   :  { %v71_v20 = vpop.permute.xlu0 %70 }
  0xe1   :  { %v175_v28 = vpop.f32.mrb[0].mxu0 }
  0xe2   :  { %v176_v29 = vadd.f32 %v175_v28, %v41_v27  ;;  %v177_v30 = vpop.f32.mrb[1].mxu0 }
  0xe3   :  { %v178_v32 = vadd.f32 %v177_v30, %v41_v27  ;;  %v179_v33 = vpop.f32.mrb[2].mxu0  ;;  %v76_v27 = vpop.permute.xlu1 %75 }
  0xe4   :  { %v214_v34 = vmul.f32 0.1, %v176_v29  ;;  %v180_v35 = vadd.f32 %v179_v33, %v46_v31  ;;  %v181_v36 = vpop.f32.mrb[3].mxu0 }
  0xe5   :  { %v215_v38 = vmul.f32 0.1, %v178_v32  ;;  %v182_v39 = vadd.f32 %v181_v36, %v46_v31 }
  0xe6   :  { %v216_v40 = vmul.f32 0.1, %v180_v35  ;;  %v230_v42 = vmax.f32 %v176_v29, %v214_v34 }
  0xe7   :  { %v217_v41 = vmul.f32 0.1, %v182_v39  ;;  %v231_v45 = vmax.f32 %v178_v32, %v215_v38 }
  0xe8   :  { %v232_v43 = vmax.f32 %v180_v35, %v216_v40 }
  0xe9   :  { %v185_v44 = vpop.f32.mrb[4].mxu0  ;;  %v233_v46 = vmax.f32 %v182_v39, %v217_v41 }
  0xea   :  { %v186_v47 = vadd.f32 %v185_v44, %v51_v37  ;;  %v187_v48 = vpop.f32.mrb[5].mxu0  ;;  %v250_v49 = vpack.c.bf16 %v232_v43, %v230_v42  ;;  %v632_v44 = vld [vmem:[%s802_s1 + $0x20] sm:$0xff]  }
  0xeb   :  { %v188_v51 = vadd.f32 %v187_v48, %v51_v37  ;;  %v189_v52 = vpop.f32.mrb[6].mxu0  ;;  %v251_v53 = vpack.c.bf16 %v233_v46, %v231_v45  ;;  %v633_v45 = vld [vmem:[%s802_s1 + $0x28] sm:$0xff]   ;;  %v265_v46 = vpop.permute.xlu0 %264 }
  0xec   :  { %v218_v54 = vmul.f32 0.1, %v186_v47  ;;  %v190_v55 = vadd.f32 %v189_v52, %v56_v50  ;;  %v191_v56 = vpop.f32.mrb[7].mxu0 }
  0xed   :  { %v219_v57 = vmul.f32 0.1, %v188_v51  ;;  %v192_v58 = vadd.f32 %v191_v56, %v56_v50  ;;  %299 = vmatprep.subr.bf16.mxu1 %v251_v53  ;;  %v270_v50 = vpop.permute.xlu1 %269 }
  0xee   :  { %v220_v59 = vmul.f32 0.1, %v190_v55  ;;  %300 = vmatpush1.bf16.msra.mxu1 %v250_v49  ;;  %v234_v61 = vmax.f32 %v186_v47, %v218_v54 }
  0xef   :  { %v221_v60 = vmul.f32 0.1, %v192_v58  ;;  %v235_v0 = vmax.f32 %v188_v51, %v219_v57 }
  0xf0   :  { %v236_v62 = vmax.f32 %v190_v55, %v220_v59 }
  0xf1   :  { %v237_v1 = vmax.f32 %v192_v58, %v221_v60  ;;  %v195_v3 = vpop.f32.mrb[8].mxu0 }
  0xf2   :  { %v196_v4 = vadd.f32 %v195_v3, %v61_v63  ;;  %v197_v5 = vpop.f32.mrb[9].mxu0  ;;  %v252_v6 = vpack.c.bf16 %v236_v62, %v234_v61  ;;  %v275_v62 = vpop.permute.xlu0 %274 }
  0xf3   :  { %v198_v8 = vadd.f32 %v197_v5, %v61_v63  ;;  %v199_v9 = vpop.f32.mrb[10].mxu0  ;;  %v253_v10 = vpack.c.bf16 %v237_v1, %v235_v0 }
  0xf4   :  { %v222_v11 = vmul.f32 0.1, %v196_v4  ;;  %v200_v12 = vadd.f32 %v199_v9, %v66_v7  ;;  %v201_v13 = vpop.f32.mrb[11].mxu0 }
  0xf5   :  { %v223_v14 = vmul.f32 0.1, %v198_v8  ;;  %v202_v15 = vadd.f32 %v201_v13, %v66_v7  ;;  %301 = vmatprep.subr.bf16.mxu1 %v253_v10 }
  0xf6   :  { %v224_v16 = vmul.f32 0.1, %v200_v12  ;;  %302 = vmatpush1.bf16.msra.mxu1 %v252_v6  ;;  %v238_v18 = vmax.f32 %v196_v4, %v222_v11  ;;  %v280_v6 = vpop.permute.xlu1 %279 }
  0xf7   :  { %v225_v17 = vmul.f32 0.1, %v202_v15  ;;  %v239_v21 = vmax.f32 %v198_v8, %v223_v14 }
  0xf8   :  { %v240_v19 = vmax.f32 %v200_v12, %v224_v16 }
  0xf9   :  { %v241_v22 = vmax.f32 %v202_v15, %v225_v17  ;;  %v205_v23 = vpop.f32.mrb[12].mxu0 }
  0xfa   :  { %v206_v24 = vadd.f32 %v205_v23, %v71_v20  ;;  %v207_v25 = vpop.f32.mrb[13].mxu0  ;;  %v254_v26 = vpack.c.bf16 %v240_v19, %v238_v18  ;;  %v634_v23 = vld [vmem:[%s802_s1 + $0x30] sm:$0xff]  }
  0xfb   :  { %v208_v28 = vadd.f32 %v207_v25, %v71_v20  ;;  %v209_v29 = vpop.f32.mrb[14].mxu0  ;;  %v255_v30 = vpack.c.bf16 %v241_v22, %v239_v21 }
  0xfc   :  { %v226_v31 = vmul.f32 0.1, %v206_v24  ;;  %v210_v32 = vadd.f32 %v209_v29, %v76_v27  ;;  %v211_v33 = vpop.f32.mrb[15].mxu0 }
  0xfd   :  { %v227_v34 = vmul.f32 0.1, %v208_v28  ;;  %v212_v35 = vadd.f32 %v211_v33, %v76_v27  ;;  %303 = vmatprep.subr.bf16.mxu1 %v255_v30 }
  0xfe   :  { %v228_v36 = vmul.f32 0.1, %v210_v32  ;;  %304 = vmatpush1.bf16.msra.mxu1 %v254_v26  ;;  %v242_v38 = vmax.f32 %v206_v24, %v226_v31  ;;  %v379_v24 = vpop.permute.xlu0 %378 }
  0xff   :  { %v229_v37 = vmul.f32 0.1, %v212_v35  ;;  %v243_v40 = vmax.f32 %v208_v28, %v227_v34  ;;  %v384_v28 = vpop.permute.xlu1 %383 }
 0x100   :  { %v244_v39 = vmax.f32 %v210_v32, %v228_v36 }
 0x101   :  { %v245_v41 = vmax.f32 %v212_v35, %v229_v37 }
 0x102   :  { %v256_v42 = vpack.c.bf16 %v244_v39, %v242_v38 }
 0x103   :  { %v257_v43 = vpack.c.bf16 %v245_v41, %v243_v40 }
 0x105   :  { %305 = vmatprep.subr.bf16.mxu1 %v257_v43  ;;  %v446_v43 = vld [vmem:[%s802_s1 + $0x38] sm:$0xf] }
 0x106   :  { %306 = vmatpush1.bf16.msra.mxu1 %v256_v42 }
 0x109   :  { %607 = vmatmul.mubr.msk.bf16.vlgmr.msra.gmra.mrb[0].mxu1 %vm292_vm1, %v632_v44  ;;  %v453_v44 = vpop.permute.xlu0 %452 }
 0x10a   :  { %341 = vmatprep.mubr.bf16.mxu1 %v659_v2 }
 0x111   :  { %608 = vmatmul.mubr.msk.bf16.gmra.mrb[4].mxu1 %vm292_vm1, %v633_v45 }
 0x112   :  { %427 = vmatprep.mubr.bf16.mxu1 %v659_v2 }
 0x1dc   :  { %v333_v47 = vpop.f32.mrb[0].mxu1 }
 0x1dd   :  { %v334_v48 = vadd.f32 %v333_v47, %v265_v46  ;;  %v335_v49 = vpop.f32.mrb[1].mxu1 }
 0x1de   :  { %v336_v51 = vadd.f32 %v335_v49, %v265_v46  ;;  %v337_v52 = vpop.f32.mrb[2].mxu1 }
 0x1df   :  { %v352_v53 = vmul.f32 0.1, %v334_v48  ;;  %v338_v54 = vadd.f32 %v337_v52, %v270_v50  ;;  %v339_v55 = vpop.f32.mrb[3].mxu1 }
 0x1e0   :  { %v353_v56 = vmul.f32 0.1, %v336_v51  ;;  %v340_v57 = vadd.f32 %v339_v55, %v270_v50 }
 0x1e1   :  { %v354_v58 = vmul.f32 0.1, %v338_v54  ;;  %v360_v60 = vmax.f32 %v334_v48, %v352_v53 }
 0x1e2   :  { %v355_v59 = vmul.f32 0.1, %v340_v57  ;;  %v361_v63 = vmax.f32 %v336_v51, %v353_v56 }
 0x1e3   :  { %v362_v61 = vmax.f32 %v338_v54, %v354_v58  ;;  %v504_v58 = vld [vmem:[%s802_s1 + $0x3c] sm:$0x1] }
 0x1e4   :  { %v363_v0 = vmax.f32 %v340_v57, %v355_v59  ;;  %v343_v1 = vpop.f32.mrb[4].mxu1  ;;  %v511_v59 = vpop.permute.xlu1 %510 }
 0x1e5   :  { %v370_v3 = vpack.c.bf16 %v362_v61, %v360_v60  ;;  %v344_v4 = vadd.f32 %v343_v1, %v275_v62  ;;  %v345_v5 = vpop.f32.mrb[5].mxu1 }
 0x1e6   :  { %v346_v7 = vadd.f32 %v345_v5, %v275_v62  ;;  %v347_v8 = vpop.f32.mrb[6].mxu1  ;;  %v371_v9 = vpack.c.bf16 %v363_v0, %v361_v63 }
 0x1e7   :  { %v356_v10 = vmul.f32 0.1, %v344_v4  ;;  %v348_v11 = vadd.f32 %v347_v8, %v280_v6  ;;  %v349_v12 = vpop.f32.mrb[7].mxu1 }
 0x1e8   :  { %v357_v13 = vmul.f32 0.1, %v346_v7  ;;  %v350_v14 = vadd.f32 %v349_v12, %v280_v6  ;;  %395 = vmatprep.subr.bf16.mxu1 %v371_v9 }
 0x1e9   :  { %v358_v15 = vmul.f32 0.1, %v348_v11  ;;  %396 = vmatpush1.bf16.msra.mxu1 %v370_v3  ;;  %v364_v17 = vmax.f32 %v344_v4, %v356_v10 }
 0x1ea   :  { %v359_v16 = vmul.f32 0.1, %v350_v14  ;;  %v365_v19 = vmax.f32 %v346_v7, %v357_v13 }
 0x1eb   :  { %v366_v18 = vmax.f32 %v348_v11, %v358_v15 }
 0x1ec   :  { %v367_v20 = vmax.f32 %v350_v14, %v359_v16 }
 0x1ed   :  { %v372_v21 = vpack.c.bf16 %v366_v18, %v364_v17 }
 0x1ee   :  { %v373_v22 = vpack.c.bf16 %v367_v20, %v365_v19 }
 0x1f0   :  { %397 = vmatprep.subr.bf16.mxu1 %v373_v22 }
 0x1f1   :  { %398 = vmatpush1.bf16.msra.mxu1 %v372_v21 }
 0x1f4   :  { %610 = vmatmul.mubr.msk.bf16.vlgmr.msra.gmra.mrb[8].mxu1 %vm391_vm2, %v634_v23 }
 0x1f5   :  { %491 = vmatprep.mubr.bf16.mxu1 %v659_v2 }
 0x2c7   :  { %v429_v25 = vpop.f32.mrb[8].mxu1 }
 0x2c8   :  { %v430_v26 = vadd.f32 %v429_v25, %v379_v24  ;;  %v431_v27 = vpop.f32.mrb[9].mxu1 }
 0x2c9   :  { %v432_v29 = vadd.f32 %v431_v27, %v379_v24  ;;  %v433_v30 = vpop.f32.mrb[10].mxu1 }
 0x2ca   :  { %v438_v31 = vmul.f32 0.1, %v430_v26  ;;  %v434_v32 = vadd.f32 %v433_v30, %v384_v28  ;;  %v435_v33 = vpop.f32.mrb[11].mxu1 }
 0x2cb   :  { %v439_v34 = vmul.f32 0.1, %v432_v29  ;;  %v436_v35 = vadd.f32 %v435_v33, %v384_v28 }
 0x2cc   :  { %v440_v36 = vmul.f32 0.1, %v434_v32  ;;  %v442_v38 = vmax.f32 %v430_v26, %v438_v31 }
 0x2cd   :  { %v441_v37 = vmul.f32 0.1, %v436_v35  ;;  %v443_v40 = vmax.f32 %v432_v29, %v439_v34 }
 0x2ce   :  { %v444_v39 = vmax.f32 %v434_v32, %v440_v36 }
 0x2cf   :  { %v445_v41 = vmax.f32 %v436_v35, %v441_v37 }
 0x2d0   :  { %v447_v42 = vpack.c.bf16 %v444_v39, %v442_v38 }
 0x2d1   :  { %v448_v2 = vpack.c.bf16 %v445_v41, %v443_v40 }
 0x2d3   :  { %459 = vmatprep.subr.bf16.mxu1 %v448_v2 }
 0x2d4   :  { %460 = vmatpush1.bf16.msra.mxu1 %v447_v42 }
 0x2d7   :  { %611 = vmatmul.mubr.msk.bf16.vlgmr.msra.gmra.mrb[12].mxu1 %vm455_vm3, %v446_v43 }
 0x3aa   :  { %v493_v45 = vpop.f32.mrb[12].mxu1 }
 0x3ab   :  { %v494_v46 = vadd.f32 %v493_v45, %v453_v44  ;;  %v495_v47 = vpop.f32.mrb[13].mxu1 }
 0x3ac   :  { %v496_v48 = vadd.f32 %v495_v47, %v453_v44  ;;  %v497_v49 = vpop.f32.mrb[14].mxu1 }
 0x3ad   :  { %v500_v50 = vmul.f32 0.1, %v494_v46  ;;  %v498_v51 = vpop.f32.mrb[15].mxu1 }
 0x3ae   :  { %v501_v52 = vmul.f32 0.1, %v496_v48 }
 0x3af   :  { %v502_v53 = vmax.f32 %v494_v46, %v500_v50 }
 0x3b0   :  { %v503_v54 = vmax.f32 %v496_v48, %v501_v52 }
 0x3b1   :  { %v505_v55 = vpack.c.bf16 %v502_v53, %v502_v53 }
 0x3b2   :  { %v506_v56 = vpack.c.bf16 %v503_v54, %v503_v54 }
 0x3b3   :  { %v519_v57 = vsel %vm517_vm4, %v505_v55, 0 }
 0x3b4   :  { %612 = vmatprep.subr.msk.bf16.mxu0 %vm517_vm4, %v506_v56 }
 0x3b5   :  { %525 = vmatpush1.bf16.msra.mxu0 %v519_v57 }
 0x3b8   :  { %613 = vmatmul.mubr.msk.bf16.vlgmr.msra.gmra.mrb[16].mxu0 %vm513_vm5, %v504_v58 }
 0x48b   :  { %v558_v60 = vpop.f32.mrb[16].mxu0 }
 0x48c   :  { %v559_v61 = vadd.f32 %v558_v60, %v511_v59  ;;  %v560_v62 = vpop.f32.mrb[17].mxu0 }
 0x48d   :  { %v561_v63 = vadd.f32 %v560_v62, %v511_v59  ;;  %v562_v0 = vpop.f32.mrb[18].mxu0 }
 0x48e   :  { %v563_v1 = vpop.f32.mrb[19].mxu0 }
 0x48f   :  { %v567_v3 = vcombine.low %v559_v61, %v561_v63 }
 0x491   :  { %614 = vst.sshfl [vmem:[#allocation2] sm:$0x33 pattern:$0x76325410] %v567_v3 }
 0x492   :  { %646 = shalt.err (!%p643_p4)
}
 0x493   :  { %s647_s21 = scalar_lea.hbm %s804_s3, 64 }
 0x494   :  { %p648_p5 = scmp.ne.s32.totalorder %s804_s3, %s647_s21  ;;  %p651_p6 = scmp.lt.u32.totalorder %s647_s21, %s804_s3 }
 0x496   :  { %p653_p7 = pnand %p651_p6, %p648_p5 }
 0x498   :  { %656 = shalt.err (!%p653_p7)
}
 0x499   :  { %586 = dma.vmem_to_hbm [thread:$0]  %s584_s18, 64, %s804_s3, [#allocation3]  }
 0x49a   :  { %657 = dma.done.wait [#allocation3], 64  }
 0x49b   :  { %658 = vsyncadd [#allocation3], 4294967232 }
 0x49c   :  { %590 = vsyncpa [#allocation3], 1 }

</bundles_post_ra>
